<compile_context>
chip_gen: v5e
topology: v5e:2x2
jax: 0.10.0
libtpu: 0.0.40
codegen_flags: <defaults>
</compile_context>

<pallas_src>
import jax
import jax.numpy as jnp
from jax.experimental import pallas as pl
from jax.experimental.pallas import tpu as pltpu


# --------------------------------------------------------------------------
# Kernel
# --------------------------------------------------------------------------
def _sos_fused_kernel(meta_ref, w_ref, b_ref, out_ref):
    """One fused linear tile: out = meta @ W_cat + b_cat.

    meta_ref: (TB, M)   -- batch tile of metadata (compute dtype)
    w_ref:    (M, TN)   -- column tile of the concatenated embedding weights
    b_ref:    (1, TN)   -- column tile of the concatenated biases (f32)
    out_ref:  (TB, TN)  -- concatenated SOS embedding tile (f32)
    """
    acc = jnp.dot(meta_ref[...], w_ref[...], preferred_element_type=jnp.float32)
    out_ref[...] = (acc + b_ref[...]).astype(out_ref.dtype)


# --------------------------------------------------------------------------
# Helpers
# --------------------------------------------------------------------------
def _round_up(x, m):
    return ((x + m - 1) // m) * m


def _pick_n_tile(total_padded, m, w_itemsize, budget_bytes=16 << 20):
    """Largest multiple of 128 dividing total_padded with W tile under budget."""
    if m * total_padded * w_itemsize <= budget_bytes:
        return total_padded
    best = 128
    t = 128
    while t <= total_padded:
        if total_padded % t == 0 and m * t * w_itemsize <= budget_bytes:
            best = t
        t += 128
    return best


def _pick_batch_tile(b_pad, batch_tile, tb_cap):
    """Largest multiple of 8 dividing b_pad, under caps, preferring >=2 steps."""
    cap = max(8, min(batch_tile, b_pad, (tb_cap // 8) * 8))
    candidates = [t for t in range(8, cap + 1, 8) if b_pad % t == 0]
    if not candidates:                      # b_pad is a multiple of 8, so 8 always divides
        return 8
    # Prefer >=2 grid steps (megacore on v7x) as long as the tile stays sizeable.
    multi = [t for t in candidates if (b_pad // t) >= 2 and t >= 64]
    return max(multi) if multi else max(candidates)


# --------------------------------------------------------------------------
# "Module init": fuse + pad the per-embedding parameters once.
# --------------------------------------------------------------------------
def prepare_sos_params(weights, biases, *, compute_dtype=jnp.float32):
    """Concatenate the per-embedding weights/biases once (weight-stationary).

    weights: list of (M, d_i)
    biases:  list of (1, d_i) or (d_i,)
    Returns a dict with lane-padded fused parameters.
    """
    assert len(weights) == len(biases) and len(weights) > 0
    m = int(weights[0].shape[0])
    ws, bs = [], []
    for w, b in zip(weights, biases):
        w = jnp.asarray(w)
        assert w.shape[0] == m, "all embeddings must share the metadata dim"
        b = jnp.asarray(b)
        if b.ndim == 1:                     # PyTorch Linear bias is (d_i,)
            b = b[None, :]
        assert b.shape == (1, w.shape[1])
        ws.append(w.astype(compute_dtype))
        bs.append(b.astype(jnp.float32))

    w_cat = jnp.concatenate(ws, axis=1)     # (M, total), compute dtype
    b_cat = jnp.concatenate(bs, axis=1)     # (1, total), f32
    total = int(w_cat.shape[1])

    # Lane-dense output: pad total up to a multiple of 128 (done once here).
    total_padded = _round_up(total, 128)
    if total_padded != total:
        w_cat = jnp.pad(w_cat, ((0, 0), (0, total_padded - total)))
        b_cat = jnp.pad(b_cat, ((0, 0), (0, total_padded - total)))

    return {"w_cat": w_cat, "b_cat": b_cat, "total": total,
            "total_padded": total_padded, "m": m}


# --------------------------------------------------------------------------
# Forward
# --------------------------------------------------------------------------
def sos_embedding_forward(metadata, params, *, batch_tile=512,
                          allow_xla_fast_path=True):
    """Pallas implementation of SOSEmbedding.forward on pre-fused params.

    metadata: (B, M) float32 (cast to the params' compute dtype internally)
    params:   output of prepare_sos_params
    returns:  (B, sum(d_i)) float32
    """
    w_cat = params["w_cat"]
    b_cat = params["b_cat"]
    total = params["total"]
    total_padded = params["total_padded"]
    m = params["m"]
    compute_dtype = w_cat.dtype

    B = int(metadata.shape[0])
    assert metadata.shape[1] == m

    meta = metadata.astype(compute_dtype) if metadata.dtype != compute_dtype else metadata

    # Tiny-shape fast path: avoid pallas_call launch + pipeline overhead.
    if allow_xla_fast_path and B * total_padded <= 8 * 1024:
        out = jnp.dot(meta, w_cat, preferred_element_type=jnp.float32) + b_cat
        return out[:, :total].astype(jnp.float32)

    # Batch padding: only up to a multiple of 8 (no pad copy when 8-aligned).
    b_pad = _round_up(B, 8)
    if b_pad != B:
        meta = jnp.pad(meta, ((0, b_pad - B), (0, 0)))

    meta_itemsize = jnp.dtype(meta.dtype).itemsize
    w_itemsize = jnp.dtype(compute_dtype).itemsize

    # Column (N) tile: keep the resident weight block <= ~16 MiB (v7x budget).
    tn = _pick_n_tile(total_padded, m, w_itemsize)
    # Batch tile: keep double-buffered activation tiles <= ~24 MiB.
    per_row_bytes = 2 * (m * meta_itemsize + tn * 4)
    tb_cap = max(8, (24 << 20) // per_row_bytes)
    tb = _pick_batch_tile(b_pad, batch_tile, tb_cap)

    grid = (b_pad // tb, total_padded // tn)

    # VMEM budget (assume 2 weight buffers for the fallback path).
    needed = (2 * tb * m * meta_itemsize          # metadata (double-buffered)
              + 2 * tb * tn * 4                   # output tile (double-buffered)
              + 2 * (m * tn * w_itemsize)         # W_cat block
              + 2 * (8 * tn * 4))                 # bias block (sublane-padded)
    vmem_limit = min(64 << 20, max(32 << 20, int(needed * 1.5) + (1 << 20)))

    cost = pl.CostEstimate(
        flops=2 * b_pad * m * total_padded,
        bytes_accessed=(b_pad * m * meta_itemsize
                        + m * total_padded * w_itemsize
                        + total_padded * 4
                        + b_pad * total_padded * 4),
        transcendentals=0,
    )

    def run(single_buffer_weights):
        if single_buffer_weights:
            # Constant index maps -> never re-fetched; one buffer is enough.
            w_spec = pl.BlockSpec((m, tn), lambda i, j: (0, j),
                                  pipeline_mode=pl.Buffered(1))
            b_spec = pl.BlockSpec((1, tn), lambda i, j: (0, j),
                                  pipeline_mode=pl.Buffered(1))
        else:
            w_spec = pl.BlockSpec((m, tn), lambda i, j: (0, j))
            b_spec = pl.BlockSpec((1, tn), lambda i, j: (0, j))
        return pl.pallas_call(
            _sos_fused_kernel,
            out_shape=jax.ShapeDtypeStruct((b_pad, total_padded), jnp.float32),
            grid=grid,
            in_specs=[
                pl.BlockSpec((tb, m), lambda i, j: (i, 0)),   # metadata (batch-tiled)
                w_spec,                                       # fused weights (resident)
                b_spec,                                       # fused bias (resident)
            ],
            out_specs=pl.BlockSpec((tb, tn), lambda i, j: (i, j)),
            compiler_params=pltpu.CompilerParams(
                dimension_semantics=("parallel", "parallel"),
                vmem_limit_bytes=vmem_limit,
            ),
            cost_estimate=cost,
        )(meta, w_cat, b_cat)

    try:
        out_padded = run(True)
    except Exception:
        # Some JAX versions reject buffer_count=1; fall back to default buffering.
        out_padded = run(False)

    return out_padded[:B, :total]


def sos_embedding_forward_from_lists(metadata, weights, biases, **kw):
    """Convenience wrapper matching the old signature (fuses params per call)."""
    return sos_embedding_forward(metadata, prepare_sos_params(weights, biases), **kw)


def sos_embedding_reference(metadata, weights, biases):
    """Pure-JAX reference matching the PyTorch forward."""
    sos_list = []
    for w, b in zip(weights, biases):
        b = jnp.asarray(b)
        if b.ndim == 1:
            b = b[None, :]
        sos_list.append(metadata @ w + b)
    return jnp.concatenate(sos_list, axis=1)


# TODO(synk): BaseSOSEmbedding subclasses may derive their vectors from
# arbitrary metadata_dict logic; here each one is modeled as a linear
# projection of a shared metadata vector (weight.T, bias), which covers the
# concat-along-dim=1 semantics of SOSEmbedding.forward.

if __name__ == "__main__":
    key = jax.random.PRNGKey(0)

    # ---- Test 1: small shapes; total=120 exercises lane padding to 128,
    #              B=2 exercises batch padding to 8. ----
    B, M = 2, 32
    dims = (32, 48, 40)                       # total = 120 -> padded to 128
    key, k_meta = jax.random.split(key)
    metadata = jax.random.normal(k_meta, (B, M), dtype=jnp.float32)
    weights, biases = [], []
    for d in dims:
        key, kw, kb = jax.random.split(key, 3)
        weights.append(jax.random.normal(kw, (M, d), dtype=jnp.float32) * 0.02)
        biases.append(jax.random.normal(kb, (d,), dtype=jnp.float32) * 0.02)  # 1-D bias (PyTorch style)

    params = prepare_sos_params(weights, biases)            # fused once ("init")
    out = sos_embedding_forward(metadata, params, allow_xla_fast_path=False)
    out = jax.block_until_ready(out)
    ref = sos_embedding_reference(metadata, weights, biases)
    assert out.shape == (B, sum(dims)), out.shape
    assert jnp.allclose(out, ref, atol=1e-5, rtol=1e-5), "mismatch vs reference (test 1)"

    # XLA fast path gives the same answer.
    out_fast = jax.block_until_ready(
        sos_embedding_forward(metadata, params, allow_xla_fast_path=True))
    assert jnp.allclose(out_fast, ref, atol=1e-5, rtol=1e-5), "mismatch (fast path)"

    # ---- Test 2: multi-step batch grid (2 tiles of 24 rows), 128-aligned total. ----
    B2, dims2 = 48, (64, 64, 128)                            # total = 256
    key, k_meta2 = jax.random.split(key)
    metadata2 = jax.random.normal(k_meta2, (B2, M), dtype=jnp.float32)
    weights2, biases2 = [], []
    for d in dims2:
        key, kw, kb = jax.random.split(key, 3)
        weights2.append(jax.random.normal(kw, (M, d), dtype=jnp.float32) * 0.02)
        biases2.append(jax.random.normal(kb, (1, d), dtype=jnp.float32) * 0.02)
    params2 = prepare_sos_params(weights2, biases2)
    out2 = jax.block_until_ready(
        sos_embedding_forward(metadata2, params2, batch_tile=24,
                              allow_xla_fast_path=False))
    ref2 = sos_embedding_reference(metadata2, weights2, biases2)
    assert out2.shape == (B2, sum(dims2)), out2.shape
    assert jnp.allclose(out2, ref2, atol=1e-5, rtol=1e-5), "mismatch vs reference (test 2)"

    # ---- Test 3: optional bf16 weight/metadata path (f32 accumulate/output). ----
    params_bf16 = prepare_sos_params(weights, biases, compute_dtype=jnp.bfloat16)
    out_bf16 = jax.block_until_ready(
        sos_embedding_forward(metadata, params_bf16, allow_xla_fast_path=False))
    assert out_bf16.shape == (B, sum(dims))
    assert jnp.allclose(out_bf16, ref, atol=2e-2, rtol=2e-2), "mismatch (bf16 path)"

    print("KERNEL_OK")
</pallas_src>

<mosaic_0001>
module attributes {stable_mosaic.version = 11 : i64} {
  func.func @_sos_fused_kernel(%arg0: i32, %arg1: i32, %arg2: memref<8x32xf32, #tpu.memory_space<vmem>>, %arg3: memref<32x128xf32, #tpu.memory_space<vmem>>, %arg4: memref<1x128xf32, #tpu.memory_space<vmem>>, %arg5: memref<8x128xf32, #tpu.memory_space<vmem>>) attributes {dimension_semantics = [#tpu.dimension_semantics<parallel>, #tpu.dimension_semantics<parallel>], iteration_bounds = array<i64: 1, 1>, scalar_prefetch = 0 : i64, scratch_operands = 0 : i64, tpu.core_type = #tpu.core_type<tc>, window_params = [{transform_indices = @transform_0, window_bounds = array<i64: 8, 32>}, {pipeline_mode = #tpu.pipeline_mode<synchronous>, transform_indices = @transform_1, window_bounds = array<i64: 32, 128>}, {pipeline_mode = #tpu.pipeline_mode<synchronous>, transform_indices = @transform_2, window_bounds = array<i64: 1, 128>}, {transform_indices = @transform_3, window_bounds = array<i64: 8, 128>}]} {
    %c0 = arith.constant 0 : index
    %c0_0 = arith.constant 0 : index
    %0 = vector.load %arg2[%c0, %c0_0] : memref<8x32xf32, #tpu.memory_space<vmem>>, vector<8x32xf32>
    %c0_1 = arith.constant 0 : index
    %c0_2 = arith.constant 0 : index
    %1 = vector.load %arg3[%c0_1, %c0_2] : memref<32x128xf32, #tpu.memory_space<vmem>>, vector<32x128xf32>
    %cst = arith.constant dense<0.000000e+00> : vector<8x128xf32>
    %2 = tpu.matmul %0, %1, %cst {dimension_numbers = #tpu.dot_dimension_numbers<[1], [0], [0], [1], [0, 0, 1, 1], [], []>} : vector<8x32xf32>, vector<32x128xf32>, vector<8x128xf32> -> vector<8x128xf32>
    %c0_3 = arith.constant 0 : index
    %c0_4 = arith.constant 0 : index
    %3 = vector.load %arg4[%c0_3, %c0_4] : memref<1x128xf32, #tpu.memory_space<vmem>>, vector<1x128xf32>
    %4 = vector.broadcast %3 : vector<1x128xf32> to vector<8x128xf32>
    %5 = arith.addf %2, %4 : vector<8x128xf32>
    %c0_5 = arith.constant 0 : index
    %c0_6 = arith.constant 0 : index
    %6 = vector.load %arg5[%c0_5, %c0_6] : memref<8x128xf32, #tpu.memory_space<vmem>>, vector<8x128xf32>
    tpu.vector_store %arg5[%c0_5, %c0_6], %5 {strides = array<i32>} : memref<8x128xf32, #tpu.memory_space<vmem>>, vector<8x128xf32>,
    return
  }
  func.func @transform_0(%arg0: i32, %arg1: i32) -> (i32, i32) {
    %c0_i32 = arith.constant 0 : i32
    %c0_i32_0 = arith.constant 0 : i32
    return %arg0, %c0_i32 : i32, i32
  }
  func.func @transform_1(%arg0: i32, %arg1: i32) -> (i32, i32) {
    %c0_i32 = arith.constant 0 : i32
    %c0_i32_0 = arith.constant 0 : i32
    return %c0_i32, %arg1 : i32, i32
  }
  func.func @transform_2(%arg0: i32, %arg1: i32) -> (i32, i32) {
    %c0_i32 = arith.constant 0 : i32
    %c0_i32_0 = arith.constant 0 : i32
    return %c0_i32, %arg1 : i32, i32
  }
  func.func @transform_3(%arg0: i32, %arg1: i32) -> (i32, i32) {
    %c0_i32 = arith.constant 0 : i32
    return %arg0, %arg1 : i32, i32
  }
}

module attributes {stable_mosaic.version = 11 : i64} {
  func.func @_sos_fused_kernel(%arg0: i32, %arg1: i32, %arg2: memref<8x32xf32, #tpu.memory_space<vmem>>, %arg3: memref<32x128xf32, #tpu.memory_space<vmem>>, %arg4: memref<1x128xf32, #tpu.memory_space<vmem>>, %arg5: memref<8x128xf32, #tpu.memory_space<vmem>>) attributes {dimension_semantics = [#tpu.dimension_semantics<parallel>, #tpu.dimension_semantics<parallel>], iteration_bounds = array<i64: 1, 1>, scalar_prefetch = 0 : i64, scratch_operands = 0 : i64, tpu.core_type = #tpu.core_type<tc>, window_params = [{transform_indices = @transform_0, window_bounds = array<i64: 8, 32>}, {transform_indices = @transform_1, window_bounds = array<i64: 32, 128>}, {transform_indices = @transform_2, window_bounds = array<i64: 1, 128>}, {transform_indices = @transform_3, window_bounds = array<i64: 8, 128>}]} {
    %c0 = arith.constant 0 : index
    %c0_0 = arith.constant 0 : index
    %0 = vector.load %arg2[%c0, %c0_0] : memref<8x32xf32, #tpu.memory_space<vmem>>, vector<8x32xf32>
    %c0_1 = arith.constant 0 : index
    %c0_2 = arith.constant 0 : index
    %1 = vector.load %arg3[%c0_1, %c0_2] : memref<32x128xf32, #tpu.memory_space<vmem>>, vector<32x128xf32>
    %cst = arith.constant dense<0.000000e+00> : vector<8x128xf32>
    %2 = tpu.matmul %0, %1, %cst {dimension_numbers = #tpu.dot_dimension_numbers<[1], [0], [0], [1], [0, 0, 1, 1], [], []>} : vector<8x32xf32>, vector<32x128xf32>, vector<8x128xf32> -> vector<8x128xf32>
    %c0_3 = arith.constant 0 : index
    %c0_4 = arith.constant 0 : index
    %3 = vector.load %arg4[%c0_3, %c0_4] : memref<1x128xf32, #tpu.memory_space<vmem>>, vector<1x128xf32>
    %4 = vector.broadcast %3 : vector<1x128xf32> to vector<8x128xf32>
    %5 = arith.addf %2, %4 : vector<8x128xf32>
    %c0_5 = arith.constant 0 : index
    %c0_6 = arith.constant 0 : index
    %6 = vector.load %arg5[%c0_5, %c0_6] : memref<8x128xf32, #tpu.memory_space<vmem>>, vector<8x128xf32>
    tpu.vector_store %arg5[%c0_5, %c0_6], %5 {strides = array<i32>} : memref<8x128xf32, #tpu.memory_space<vmem>>, vector<8x128xf32>,
    return
  }
  func.func @transform_0(%arg0: i32, %arg1: i32) -> (i32, i32) {
    %c0_i32 = arith.constant 0 : i32
    %c0_i32_0 = arith.constant 0 : i32
    return %arg0, %c0_i32 : i32, i32
  }
  func.func @transform_1(%arg0: i32, %arg1: i32) -> (i32, i32) {
    %c0_i32 = arith.constant 0 : i32
    %c0_i32_0 = arith.constant 0 : i32
    return %c0_i32, %arg1 : i32, i32
  }
  func.func @transform_2(%arg0: i32, %arg1: i32) -> (i32, i32) {
    %c0_i32 = arith.constant 0 : i32
    %c0_i32_0 = arith.constant 0 : i32
    return %c0_i32, %arg1 : i32, i32
  }
  func.func @transform_3(%arg0: i32, %arg1: i32) -> (i32, i32) {
    %c0_i32 = arith.constant 0 : i32
    return %arg0, %arg1 : i32, i32
  }
}

</mosaic_0001>

<bundles_post_ra>
// kernel: tpu_custom_call.1
= control target key start
LH: loop header
LB: loop body
LE: loop exit
PB: predicated region body
PF: predicated region fallthrough
CT: control target
= control target key end

     0   :  { %8 = vsyncpa [#allocation3], 0  ;;  %s219_s0 = inlined_call_operand.hbm [shape: f32[8,32], index: 0, kind: input, shape index: {}]   ;;  %s220_s1 = inlined_call_operand.hbm [shape: f32[32,128], index: 1, kind: input, shape index: {}]   ;;  %s221_s2 = inlined_call_operand.vmem [shape: f32[1,128], index: 2, kind: input, shape index: {}]   ;;  %s222_s3 = inlined_call_operand.hbm [shape: f32[8,128], index: 3, kind: output, shape index: {}]  }
   0x1   :  { %9 = vsyncpa [#allocation6], 0 }
   0x2   :  { %10 = vsyncpa [#allocation4], 0  ;;  %s16_s14 = sshll.u32 %s219_s0, 4  ;;  %s182_s15 = smov [#allocation2]   ;;  %s17_s14 = int_to_ptr.hbm [resolvable:$true] %s16_s14 }
   0x3   :  { %s18_s16 = sshll.u32 %s182_s15, 4  ;;  %s26_s19 = sshll.u32 %s220_s1, 4  ;;  %s19_s16 = int_to_ptr.vmem [resolvable:$true] %s18_s16  ;;  %s27_s19 = int_to_ptr.hbm [resolvable:$true] %s26_s19 }
   0x4   :  { %21 = dma.hbm_to_vmem [thread:$0]  %s17_s14, 128, %s19_s16, [#allocation3]  }
   0x5   :  { %s183_s20 = smov [#allocation5]   ;;  %s184_s22 = smov 128  }
   0x6   :  { %s28_s21 = sshll.u32 %s183_s20, 4  ;;  %s185_s23 = smov 8   ;;  %s29_s21 = int_to_ptr.vmem [resolvable:$true] %s28_s21 }
   0x7   :  { %34 = dma.hbm_to_vmem [thread:$0]  %s27_s19, 512, %s29_s21, [#allocation6], %s184_s22, %s184_s22, %s185_s23  }
   0x8   :  { %176 = dma.done.wait [#allocation3], 128  }
   0x9   :  { %177 = vsyncadd [#allocation3], 4294967168 }
   0xa   :  { %178 = dma.done.wait [#allocation6], 512  }
   0xb   :  { %179 = vsyncadd [#allocation6], 4294966784  ;;  %v49_v0 = vld [vmem:[#allocation5 + $0x18] sm:$0xff]  ;;  %v48_v1 = vld [vmem:[#allocation5 + $0x10] sm:$0xff]  ;;  %vm54_vm0 = vcmask 261120   ;;  %s186_s24 = smov [#allocation7]  }
   0xc   :  { %70 = vmatpush.msra.mxu0 %v49_v0  ;;  %v47_v2 = vld [vmem:[#allocation5 + $0x8] sm:$0xff]  ;;  %v46_v3 = vld [vmem:[#allocation5] sm:$0xff]  ;;  %v45_v4 = vld [vmem:[#allocation2] sm:$0xff]  ;;  %s84_s25 = sshll.u32 %s186_s24, 4  ;;  %s86_s28 = sshll.u32 %s222_s3, 4  ;;  %s85_s25 = int_to_ptr.vmem [resolvable:$true] %s84_s25  ;;  %s87_s28 = int_to_ptr.hbm [resolvable:$true] %s86_s28 }
   0xd   :  { %v103_v5 = vld [vmem:[%s221_s2] ss:$0 sm:$0xff] }
   0xe   :  { %71 = vmatpush.msra.mxu0 %v48_v1 }
  0x10   :  { %72 = vmatpush.msra.mxu0 %v47_v2 }
  0x12   :  { %73 = vmatpush.msra.mxu0 %v46_v3 }
  0x13   :  { %97 = vmatmul.msk.f32.vlgmr.msra.gmra.mxu0 %vm54_vm0, %v45_v4 }
  0x90   :  { %v75_v6 = vpop.f32.mrf.mxu0 }
  0x91   :  { %v76_v7 = vadd.f32 %v103_v5, %v75_v6 }
  0x93   :  { %78 = vst [vmem:[#allocation7] sm:$0xff] %v76_v7 }
  0x94   :  { %89 = dma.vmem_to_hbm [thread:$0]  %s85_s25, 128, %s87_s28, [#allocation4]  }
  0x95   :  { %180 = dma.done.wait [#allocation4], 128  }
  0x96   :  { %181 = vsyncadd [#allocation4], 4294967168 }
  0x97   :  { %94 = vsyncpa [#allocation3], 1 }
  0x98   :  { %95 = vsyncpa [#allocation6], 1 }
  0x99   :  { %96 = vsyncpa [#allocation4], 1 }

// kernel: tpu_custom_call.1
= control target key start
LH: loop header
LB: loop body
LE: loop exit
PB: predicated region body
PF: predicated region fallthrough
CT: control target
= control target key end

     0   :  { %8 = vsyncpa [#allocation3], 0  ;;  %s219_s0 = inlined_call_operand.hbm [shape: f32[8,32], index: 0, kind: input, shape index: {}]   ;;  %s220_s1 = inlined_call_operand.hbm [shape: f32[32,128], index: 1, kind: input, shape index: {}]   ;;  %s221_s2 = inlined_call_operand.vmem [shape: f32[1,128], index: 2, kind: input, shape index: {}]   ;;  %s222_s3 = inlined_call_operand.hbm [shape: f32[8,128], index: 3, kind: output, shape index: {}]  }
   0x1   :  { %9 = vsyncpa [#allocation6], 0 }
   0x2   :  { %10 = vsyncpa [#allocation4], 0  ;;  %s16_s14 = sshll.u32 %s219_s0, 4  ;;  %s182_s15 = smov [#allocation2]   ;;  %s17_s14 = int_to_ptr.hbm [resolvable:$true] %s16_s14 }
   0x3   :  { %s18_s16 = sshll.u32 %s182_s15, 4  ;;  %s26_s19 = sshll.u32 %s220_s1, 4  ;;  %s19_s16 = int_to_ptr.vmem [resolvable:$true] %s18_s16  ;;  %s27_s19 = int_to_ptr.hbm [resolvable:$true] %s26_s19 }
   0x4   :  { %21 = dma.hbm_to_vmem [thread:$0]  %s17_s14, 128, %s19_s16, [#allocation3]  }
   0x5   :  { %s183_s20 = smov [#allocation5]   ;;  %s184_s22 = smov 128  }
   0x6   :  { %s28_s21 = sshll.u32 %s183_s20, 4  ;;  %s185_s23 = smov 8   ;;  %s29_s21 = int_to_ptr.vmem [resolvable:$true] %s28_s21 }
   0x7   :  { %34 = dma.hbm_to_vmem [thread:$0]  %s27_s19, 512, %s29_s21, [#allocation6], %s184_s22, %s184_s22, %s185_s23  }
   0x8   :  { %176 = dma.done.wait [#allocation3], 128  }
   0x9   :  { %177 = vsyncadd [#allocation3], 4294967168 }
   0xa   :  { %178 = dma.done.wait [#allocation6], 512  }
   0xb   :  { %179 = vsyncadd [#allocation6], 4294966784  ;;  %v49_v0 = vld [vmem:[#allocation5 + $0x18] sm:$0xff]  ;;  %v48_v1 = vld [vmem:[#allocation5 + $0x10] sm:$0xff]  ;;  %vm54_vm0 = vcmask 261120   ;;  %s186_s24 = smov [#allocation7]  }
   0xc   :  { %70 = vmatpush.msra.mxu0 %v49_v0  ;;  %v47_v2 = vld [vmem:[#allocation5 + $0x8] sm:$0xff]  ;;  %v46_v3 = vld [vmem:[#allocation5] sm:$0xff]  ;;  %v45_v4 = vld [vmem:[#allocation2] sm:$0xff]  ;;  %s84_s25 = sshll.u32 %s186_s24, 4  ;;  %s86_s28 = sshll.u32 %s222_s3, 4  ;;  %s85_s25 = int_to_ptr.vmem [resolvable:$true] %s84_s25  ;;  %s87_s28 = int_to_ptr.hbm [resolvable:$true] %s86_s28 }
   0xd   :  { %v103_v5 = vld [vmem:[%s221_s2] ss:$0 sm:$0xff] }
   0xe   :  { %71 = vmatpush.msra.mxu0 %v48_v1 }
  0x10   :  { %72 = vmatpush.msra.mxu0 %v47_v2 }
  0x12   :  { %73 = vmatpush.msra.mxu0 %v46_v3 }
  0x13   :  { %97 = vmatmul.msk.f32.vlgmr.msra.gmra.mxu0 %vm54_vm0, %v45_v4 }
  0x90   :  { %v75_v6 = vpop.f32.mrf.mxu0 }
  0x91   :  { %v76_v7 = vadd.f32 %v103_v5, %v75_v6 }
  0x93   :  { %78 = vst [vmem:[#allocation7] sm:$0xff] %v76_v7 }
  0x94   :  { %89 = dma.vmem_to_hbm [thread:$0]  %s85_s25, 128, %s87_s28, [#allocation4]  }
  0x95   :  { %180 = dma.done.wait [#allocation4], 128  }
  0x96   :  { %181 = vsyncadd [#allocation4], 4294967168 }
  0x97   :  { %94 = vsyncpa [#allocation3], 1 }
  0x98   :  { %95 = vsyncpa [#allocation6], 1 }
  0x99   :  { %96 = vsyncpa [#allocation4], 1 }

</bundles_post_ra>
